<compile_context>
chip_gen: v5e
topology: v5e:2x2
jax: 0.10.0
libtpu: 0.0.40
codegen_flags: <defaults>
</compile_context>

<pallas_src>
import functools

import jax
import jax.numpy as jnp
from jax.experimental import pallas as pl
from jax.experimental.pallas import tpu as pltpu

_LANES = 128
_ROW_ALIGN = 32  # row blocks aligned for f32 / bf16 sublane tilings


def _cdiv(a, b):
    return -(-a // b)


def _round_up(a, b):
    return _cdiv(a, b) * b


def _device_kind():
    try:
        return jax.devices()[0].device_kind.lower()
    except Exception:
        return ""


def _pow_weight(q, gamma):
    """q**gamma with an unrolled product for small integer gamma (no EUP pow)."""
    g = float(gamma)
    if g.is_integer() and 0 <= g <= 16:
        gi = int(g)
        if gi == 0:
            return jnp.ones_like(q)
        w = q
        for _ in range(gi - 1):
            w = w * q
        return w
    # TODO(synk): non-integer gamma falls back to jnp.power on the EUP.
    return jnp.power(q, jnp.float32(g))


def _focal_kernel_packed(seg_ref, exp_ref, preds_ref, labels_ref, out_ref,
                         acc_ref, *, gamma, c_pad, valid_rows):
    """Small-C path: r_pack samples lane-packed into one 128-lane row."""
    c = pl.program_id(0)
    s = pl.program_id(1)

    @pl.when(s == 0)
    def _init():
        acc_ref[...] = jnp.zeros_like(acc_ref)

    x = preds_ref[...].astype(jnp.float32)               # (T, 128) in-kernel upcast
    t, w = x.shape

    # Shared-row-max stabilisation (see numerical note in the header).
    m = jnp.max(x, axis=-1, keepdims=True)
    z = x - m
    e = jnp.exp(z)

    # Per-sample sum_j exp(z): block-diagonal 0/1 matmul on the otherwise-idle
    # MXU; bf16 hi + residual passes keep ~f32 accuracy.
    e_hi = e.astype(jnp.bfloat16)
    e_lo = (e - e_hi.astype(jnp.float32)).astype(jnp.bfloat16)
    seg_m = seg_ref[...]
    seg_sum = (jnp.dot(e_hi, seg_m, preferred_element_type=jnp.float32)
               + jnp.dot(e_lo, seg_m, preferred_element_type=jnp.float32))

    logsoft = z - jnp.log(seg_sum)                        # per-lane log-softmax
    # p via cheap approx reciprocal + one Newton step (VALU) instead of a
    # second full-width exp -> ~30-40% less EUP work per element.
    r = pl.reciprocal(seg_sum, approx=True)
    r = r * (2.0 - seg_sum * r)
    p = e * r
    wgt = _pow_weight(1.0 - p, gamma)

    # Per-lane label via tiny bf16 expansion matmul (labels <= 64 exact).
    lab = jnp.dot(labels_ref[...], exp_ref[...],
                  preferred_element_type=jnp.float32).astype(jnp.int32)
    cls = jax.lax.broadcasted_iota(jnp.int32, (t, w), 1) % c_pad

    # Row-validity mask handles ragged tails / OOB partial blocks without any
    # host-side padding copy of preds.
    row0 = (c * pl.num_programs(1) + s) * t
    ridx = row0 + jax.lax.broadcasted_iota(jnp.int32, (t, w), 0)
    keep = (ridx < valid_rows) & (cls == lab)
    contrib = jnp.where(keep, -(wgt * logsoft), 0.0)

    # Pre-reduce to (8, w) so the running accumulator stays tiny (no big RMW).
    acc_ref[...] += contrib.reshape(t // 8, 8, w).sum(axis=0)

    @pl.when(s == pl.num_programs(1) - 1)
    def _finalize():
        out_ref[...] = jnp.sum(acc_ref[...]).reshape(1, 1, 1)


def _focal_kernel_flat(preds_ref, labels_ref, out_ref, acc_ref, *,
                       gamma, valid_rows):
    """Large-C path: one sample per row, block last dim == true C (no pad)."""
    c = pl.program_id(0)
    s = pl.program_id(1)

    @pl.when(s == 0)
    def _init():
        acc_ref[...] = jnp.zeros_like(acc_ref)

    x = preds_ref[...].astype(jnp.float32)                # (T, C)
    t, cdim = x.shape

    m = jnp.max(x, axis=-1, keepdims=True)
    z = x - m
    e = jnp.exp(z)
    ssum = jnp.sum(e, axis=-1, keepdims=True)             # (T, 1)

    logsoft = z - jnp.log(ssum)
    r = pl.reciprocal(ssum, approx=True)
    r = r * (2.0 - ssum * r)
    p = e * r
    wgt = _pow_weight(1.0 - p, gamma)

    lab = labels_ref[...]                                  # (T, 1) int32
    cls = jax.lax.broadcasted_iota(jnp.int32, (t, cdim), 1)

    row0 = (c * pl.num_programs(1) + s) * t
    ridx = row0 + jax.lax.broadcasted_iota(jnp.int32, (t, cdim), 0)
    keep = (ridx < valid_rows) & (cls == lab)
    contrib = jnp.where(keep, -(wgt * logsoft), 0.0)

    acc_ref[...] += contrib.reshape(t // 8, 8, cdim).sum(axis=0)

    @pl.when(s == pl.num_programs(1) - 1)
    def _finalize():
        out_ref[...] = jnp.sum(acc_ref[...]).reshape(1, 1, 1)


def focal_loss_pallas(preds, labels, gamma=2, *, _max_tile_rows=None,
                      _force_partials=None):
    """preds: (..., C) float, labels: (...,) int -> scalar mean focal loss."""
    C = preds.shape[-1]
    preds2d = preds.reshape(-1, C)
    if not jnp.issubdtype(preds2d.dtype, jnp.floating):
        preds2d = preds2d.astype(jnp.float32)
    labels1d = labels.reshape(-1).astype(jnp.int32)
    n = preds2d.shape[0]
    if n == 0:                                 # torch: mean of empty -> nan
        return jnp.float32(float("nan"))
    dt = preds2d.dtype
    itemsize = jnp.dtype(dt).itemsize

    kind = _device_kind()
    is_v7 = "v7" in kind                       # 2 TensorCores per chip
    max_tile_rows = _max_tile_rows or (4096 if is_v7 else 2048)
    tile_budget = (20 << 20) if is_v7 else (12 << 20)

    # ---- packing / layout ---------------------------------------------------
    packed = C <= _LANES // 2
    if packed:
        c_pad = max(1, pl.next_power_of_2(C))  # power-of-2 divisor of 128
        r_pack = _LANES // c_pad               # samples packed per 128-lane row
        w = _LANES
        aligned = (c_pad == C) and (n % r_pack == 0)
        if aligned:
            # No host-side pad: contiguous reshape only (free).
            rows = n // r_pack
            preds_in = preds2d.reshape(rows, w)
            labels_in = labels1d.astype(jnp.bfloat16).reshape(rows, r_pack)
        else:
            # Small pad: rows to a multiple of r_pack, classes to c_pad.
            n_ceil = _round_up(n, r_pack)
            neg_fill = -0.5 * float(jnp.finfo(dt).max)   # "-inf", finite in f32
            rows = n_ceil // r_pack
            preds_in = jnp.pad(preds2d, ((0, n_ceil - n), (0, c_pad - C)),
                               constant_values=neg_fill).reshape(rows, w)
            labels_in = jnp.pad(labels1d, (0, n_ceil - n),
                                constant_values=-1
                                ).astype(jnp.bfloat16).reshape(rows, r_pack)
        lab_row_bytes = 2 * r_pack
    else:
        c_pad = C
        r_pack = 1
        w = C                                   # block last dim == true C
        rows = n
        preds_in = preds2d                      # no host copy at all
        labels_in = labels1d.reshape(rows, 1)
        lab_row_bytes = 4

    # ---- row tile from a VMEM budget that includes compiler-materialised
    # intermediates (~10 live f32 (T, w) arrays) + double-buffered inputs -----
    per_row = w * itemsize * 2 + lab_row_bytes * 2 + 10 * 4 * w
    tile_rows = min(max_tile_rows, max(_ROW_ALIGN, tile_budget // per_row))
    tile_rows = min(tile_rows, _round_up(rows, _ROW_ALIGN))
    tile_rows = max(_ROW_ALIGN, (tile_rows // _ROW_ALIGN) * _ROW_ALIGN)

    row_blocks = _cdiv(rows, tile_rows)
    if _force_partials is not None:
        partials = _force_partials
    else:
        partials = 2 if is_v7 else 1            # core-count aware split
    partials = max(1, min(partials, row_blocks))
    steps = _cdiv(row_blocks, partials)

    fixed = 8 * w * 4 + ((w * w * 2 + r_pack * w * 2) if packed else 0)
    vmem_limit = int(per_row * tile_rows * 1.25) + fixed + (1 << 20)
    vmem_limit = min(max(vmem_limit, 16 << 20), 40 << 20)

    def row_block_idx(c, s):
        b = c * steps + s
        if partials > 1:
            # Never issue a fully out-of-bounds DMA: re-read the last block and
            # let the in-kernel row mask zero its contribution.
            b = jnp.minimum(b, row_blocks - 1)
        return b

    preds_spec = pl.BlockSpec((tile_rows, w), lambda c, s: (row_block_idx(c, s), 0))
    lab_spec = pl.BlockSpec((tile_rows, labels_in.shape[1]),
                            lambda c, s: (row_block_idx(c, s), 0))
    out_spec = pl.BlockSpec((1, 1, 1), lambda c, s: (c, 0, 0))
    scratch = [pltpu.VMEM((8, w), jnp.float32)]
    cparams = pltpu.CompilerParams(
        dimension_semantics=("parallel", "arbitrary"),
        vmem_limit_bytes=vmem_limit)

    if packed:
        lane_seg = jnp.arange(_LANES, dtype=jnp.int32) // c_pad
        seg_m = (lane_seg[:, None] == lane_seg[None, :]).astype(jnp.bfloat16)
        e_mat = (jnp.arange(r_pack, dtype=jnp.int32)[:, None]
                 == lane_seg[None, :]).astype(jnp.bfloat16)
        kernel = functools.partial(_focal_kernel_packed, gamma=gamma,
                                   c_pad=c_pad, valid_rows=rows)
        in_specs = [
            pl.BlockSpec((_LANES, _LANES), lambda c, s: (0, 0)),   # resident
            pl.BlockSpec((r_pack, _LANES), lambda c, s: (0, 0)),   # resident
            preds_spec,
            lab_spec,
        ]
        args = (seg_m, e_mat, preds_in, labels_in)
    else:
        kernel = functools.partial(_focal_kernel_flat, gamma=gamma,
                                   valid_rows=rows)
        in_specs = [preds_spec, lab_spec]
        args = (preds_in, labels_in)

    partial_sums = pl.pallas_call(
        kernel,
        out_shape=jax.ShapeDtypeStruct((partials, 1, 1), jnp.float32),
        grid_spec=pltpu.PrefetchScalarGridSpec(
            num_scalar_prefetch=0,
            grid=(partials, steps),
            in_specs=in_specs,
            out_specs=out_spec,
            scratch_shapes=scratch),
        compiler_params=cparams,
    )(*args)

    return jnp.sum(partial_sums) / jnp.float32(n)


def focal_loss_ref(preds, labels, gamma=2):
    C = preds.shape[-1]
    preds2d = preds.reshape(-1, C).astype(jnp.float32)
    labels1d = labels.reshape(-1)
    logsoft = jax.nn.log_softmax(preds2d, axis=1)
    logp = jnp.take_along_axis(logsoft, labels1d[:, None], axis=1)
    p = jnp.exp(logp)
    return jnp.mean(-jnp.power(1.0 - p, gamma) * logp)


if __name__ == "__main__":
    key = jax.random.PRNGKey(0)
    k1, k2, k3, k4, k5, k6 = jax.random.split(key, 6)

    # 1) small C, f32, aligned -> lane-packed no-copy path.
    n1, c1 = 16, 8
    preds1 = jax.random.normal(k1, (n1, c1), dtype=jnp.float32)
    labels1 = jax.random.randint(k2, (n1,), 0, c1, dtype=jnp.int32)
    out1 = jax.block_until_ready(focal_loss_pallas(preds1, labels1, gamma=2))
    ref1 = focal_loss_ref(preds1, labels1, gamma=2)
    assert jnp.allclose(out1, ref1, atol=5e-5, rtol=5e-5), (out1, ref1)

    # 2) ragged N, bf16 preds in native dtype over HBM -> padded packed fallback.
    n2, c2 = 13, 8
    preds2 = jax.random.normal(k3, (n2, c2), dtype=jnp.float32).astype(jnp.bfloat16)
    labels2 = jax.random.randint(k4, (n2,), 0, c2, dtype=jnp.int32)
    out2 = jax.block_until_ready(focal_loss_pallas(preds2, labels2, gamma=2))
    ref2 = focal_loss_ref(preds2.astype(jnp.float32), labels2, gamma=2)
    assert jnp.allclose(out2, ref2, atol=1e-4, rtol=1e-4), (out2, ref2)

    # 3) larger class count -> flat path, block last dim == true C (no pad).
    n3, c3 = 12, 160
    preds3 = jax.random.normal(k1, (n3, c3), dtype=jnp.float32)
    labels3 = jax.random.randint(k2, (n3,), 0, c3, dtype=jnp.int32)
    out3 = jax.block_until_ready(focal_loss_pallas(preds3, labels3, gamma=2))
    ref3 = focal_loss_ref(preds3, labels3, gamma=2)
    assert jnp.allclose(out3, ref3, atol=5e-5, rtol=5e-5), (out3, ref3)

    # 4) flat path: multi-step grid, 2 partial sums, ragged last block.
    n4, c4 = 100, 160
    preds4 = jax.random.normal(k5, (n4, c4), dtype=jnp.float32)
    labels4 = jax.random.randint(k6, (n4,), 0, c4, dtype=jnp.int32)
    out4 = jax.block_until_ready(
        focal_loss_pallas(preds4, labels4, gamma=2,
                          _max_tile_rows=32, _force_partials=2))
    ref4 = focal_loss_ref(preds4, labels4, gamma=2)
    assert jnp.allclose(out4, ref4, atol=5e-5, rtol=5e-5), (out4, ref4)

    # 5) packed path: multi-block grid, 2 partial sums, aligned no-copy inputs.
    n5, c5 = 2016, 4
    preds5 = jax.random.normal(k5, (n5, c5), dtype=jnp.float32)
    labels5 = jax.random.randint(k6, (n5,), 0, c5, dtype=jnp.int32)
    out5 = jax.block_until_ready(
        focal_loss_pallas(preds5, labels5, gamma=2,
                          _max_tile_rows=32, _force_partials=2))
    ref5 = focal_loss_ref(preds5, labels5, gamma=2)
    assert jnp.allclose(out5, ref5, atol=5e-5, rtol=5e-5), (out5, ref5)

    print("KERNEL_OK")
</pallas_src>

<mosaic_0001>
module attributes {stable_mosaic.version = 11 : i64} {
  func.func @_focal_kernel_packed(%arg0: i32, %arg1: i32, %arg2: memref<128x128xbf16, #tpu.memory_space<vmem>>, %arg3: memref<16x128xbf16, #tpu.memory_space<vmem>>, %arg4: memref<32x128xf32, #tpu.memory_space<vmem>>, %arg5: memref<32x16xbf16, #tpu.memory_space<vmem>>, %arg6: memref<1x1x1xf32, #tpu.memory_space<vmem>>, %arg7: memref<8x128xf32, #tpu.memory_space<vmem>>) attributes {dimension_semantics = [#tpu.dimension_semantics<parallel>, #tpu.dimension_semantics<arbitrary>], iteration_bounds = array<i64: 1, 1>, scalar_prefetch = 0 : i64, scratch_operands = 1 : i64, tpu.core_type = #tpu.core_type<tc>, window_params = [{pipeline_mode = #tpu.pipeline_mode<synchronous>, transform_indices = @transform_0, window_bounds = array<i64: 128, 128>}, {pipeline_mode = #tpu.pipeline_mode<synchronous>, transform_indices = @transform_1, window_bounds = array<i64: 16, 128>}, {transform_indices = @transform_2, window_bounds = array<i64: 32, 128>}, {transform_indices = @transform_3, window_bounds = array<i64: 32, 16>}, {transform_indices = @transform_4, window_bounds = array<i64: 1, 1, 1>}]} {
    %c0_i32 = arith.constant 0 : i32
    %0 = arith.cmpi eq, %arg1, %c0_i32 : i32
    %1 = arith.extui %0 : i1 to i32
    %c0_i32_0 = arith.constant 0 : i32
    %2 = arith.cmpi ne, %1, %c0_i32_0 : i32
    scf.if %2 {
      %cst_28 = arith.constant 0.000000e+00 : f32
      %72 = vector.broadcast %cst_28 : f32 to vector<8x128xf32>
      %c0_29 = arith.constant 0 : index
      %c0_30 = arith.constant 0 : index
      %73 = vector.load %arg7[%c0_29, %c0_30] : memref<8x128xf32, #tpu.memory_space<vmem>>, vector<8x128xf32>
      tpu.vector_store %arg7[%c0_29, %c0_30], %72 {strides = array<i32>} : memref<8x128xf32, #tpu.memory_space<vmem>>, vector<8x128xf32>,
    } else {
    }
    %c0 = arith.constant 0 : index
    %c0_1 = arith.constant 0 : index
    %3 = vector.load %arg4[%c0, %c0_1] : memref<32x128xf32, #tpu.memory_space<vmem>>, vector<32x128xf32>
    %cst = arith.constant dense<0xFF800000> : vector<32xf32>
    %4 = vector.multi_reduction <maximumf>, %3, %cst [1] : vector<32x128xf32> to vector<32xf32>
    %5 = vector.shape_cast %4 : vector<32xf32> to vector<32x1xf32>
    %6 = vector.broadcast %5 : vector<32x1xf32> to vector<32x128xf32>
    %7 = arith.subf %3, %6 : vector<32x128xf32>
    %8 = math.exp %7 : vector<32x128xf32>
    %9 = arith.truncf %8 : vector<32x128xf32> to vector<32x128xbf16>
    %10 = arith.extf %9 : vector<32x128xbf16> to vector<32x128xf32>
    %11 = arith.subf %8, %10 : vector<32x128xf32>
    %12 = arith.truncf %11 : vector<32x128xf32> to vector<32x128xbf16>
    %c0_2 = arith.constant 0 : index
    %c0_3 = arith.constant 0 : index
    %13 = vector.load %arg2[%c0_2, %c0_3] : memref<128x128xbf16, #tpu.memory_space<vmem>>, vector<128x128xbf16>
    %cst_4 = arith.constant dense<0.000000e+00> : vector<32x128xf32>
    %14 = tpu.matmul %9, %13, %cst_4 {dimension_numbers = #tpu.dot_dimension_numbers<[1], [0], [0], [1], [0, 0, 1, 1], [], []>} : vector<32x128xbf16>, vector<128x128xbf16>, vector<32x128xf32> -> vector<32x128xf32>
    %cst_5 = arith.constant dense<0.000000e+00> : vector<32x128xf32>
    %15 = tpu.matmul %12, %13, %cst_5 {dimension_numbers = #tpu.dot_dimension_numbers<[1], [0], [0], [1], [0, 0, 1, 1], [], []>} : vector<32x128xbf16>, vector<128x128xbf16>, vector<32x128xf32> -> vector<32x128xf32>
    %16 = arith.addf %14, %15 : vector<32x128xf32>
    %17 = math.log %16 : vector<32x128xf32>
    %18 = arith.subf %7, %17 : vector<32x128xf32>
    %19 = tpu.reciprocal %16 {approx = true} : vector<32x128xf32> -> vector<32x128xf32>
    %20 = arith.mulf %16, %19 : vector<32x128xf32>
    %cst_6 = arith.constant 2.000000e+00 : f32
    %21 = vector.broadcast %cst_6 : f32 to vector<32x128xf32>
    %22 = arith.subf %21, %20 : vector<32x128xf32>
    %23 = arith.mulf %19, %22 : vector<32x128xf32>
    %24 = arith.mulf %8, %23 : vector<32x128xf32>
    %cst_7 = arith.constant 1.000000e+00 : f32
    %25 = vector.broadcast %cst_7 : f32 to vector<32x128xf32>
    %26 = arith.subf %25, %24 : vector<32x128xf32>
    %27 = arith.mulf %26, %26 : vector<32x128xf32>
    %c0_8 = arith.constant 0 : index
    %c0_9 = arith.constant 0 : index
    %28 = vector.load %arg5[%c0_8, %c0_9] : memref<32x16xbf16, #tpu.memory_space<vmem>>, vector<32x16xbf16>
    %c0_10 = arith.constant 0 : index
    %c0_11 = arith.constant 0 : index
    %29 = vector.load %arg3[%c0_10, %c0_11] : memref<16x128xbf16, #tpu.memory_space<vmem>>, vector<16x128xbf16>
    %cst_12 = arith.constant dense<0.000000e+00> : vector<32x128xf32>
    %30 = tpu.matmul %28, %29, %cst_12 {dimension_numbers = #tpu.dot_dimension_numbers<[1], [0], [0], [1], [0, 0, 1, 1], [], []>} : vector<32x16xbf16>, vector<16x128xbf16>, vector<32x128xf32> -> vector<32x128xf32>
    %31 = arith.fptosi %30 : vector<32x128xf32> to vector<32x128xi32>
    %32 = tpu.iota {dimensions = array<i32: 1>} : vector<32x128xi32>
    %c8_i32 = arith.constant 8 : i32
    %c0_i32_13 = arith.constant 0 : i32
    %33 = arith.cmpi eq, %c8_i32, %c0_i32_13 : i32
    %c1_i32 = arith.constant 1 : i32
    %34 = arith.select %33, %c1_i32, %c8_i32 : i32
    %35 = vector.broadcast %34 : i32 to vector<32x128xi32>
    %36 = arith.remsi %32, %35 : vector<32x128xi32>
    %c0_i32_14 = arith.constant 0 : i32
    %37 = vector.broadcast %c0_i32_14 : i32 to vector<32x128xi32>
    %38 = arith.cmpi ne, %36, %37 : vector<32x128xi32>
    %c0_i32_15 = arith.constant 0 : i32
    %39 = vector.broadcast %c0_i32_15 : i32 to vector<32x128xi32>
    %40 = arith.cmpi slt, %36, %39 : vector<32x128xi32>
    %c0_i32_16 = arith.constant 0 : i32
    %41 = arith.cmpi slt, %34, %c0_i32_16 : i32
    %42 = vector.broadcast %41 : i1 to vector<32x128xi1>
    %43 = vector.broadcast %42 : vector<32x128xi1> to vector<32x128xi1>
    %44 = arith.xori %40, %43 : vector<32x128xi1>
    %45 = arith.andi %44, %38 : vector<32x128xi1>
    %46 = vector.broadcast %34 : i32 to vector<32x128xi32>
    %47 = arith.addi %36, %46 : vector<32x128xi32>
    %48 = arith.select %45, %47, %36 : vector<32x128xi1>, vector<32x128xi32>
    %c1_i32_17 = arith.constant 1 : i32
    %49 = arith.muli %arg0, %c1_i32_17 : i32
    %50 = arith.addi %49, %arg1 : i32
    %c32_i32 = arith.constant 32 : i32
    %51 = arith.muli %50, %c32_i32 : i32
    %52 = tpu.iota {dimensions = array<i32: 0>} : vector<32x128xi32>
    %53 = vector.broadcast %51 : i32 to vector<32x128xi32>
    %54 = arith.addi %53, %52 : vector<32x128xi32>
    %c1_i32_18 = arith.constant 1 : i32
    %55 = vector.broadcast %c1_i32_18 : i32 to vector<32x128xi32>
    %56 = arith.cmpi slt, %54, %55 : vector<32x128xi32>
    %57 = arith.cmpi eq, %48, %31 : vector<32x128xi32>
    %58 = arith.andi %56, %57 : vector<32x128xi1>
    %59 = arith.mulf %27, %18 : vector<32x128xf32>
    %cst_19 = arith.constant 0.000000e+00 : f32
    %60 = vector.broadcast %cst_19 : f32 to vector<32x128xf32>
    %61 = arith.subf %60, %59 : vector<32x128xf32>
    %cst_20 = arith.constant 0.000000e+00 : f32
    %62 = vector.broadcast %cst_20 : f32 to vector<32x128xf32>
    %63 = arith.select %58, %61, %62 : vector<32x128xi1>, vector<32x128xf32>
    %c0_21 = arith.constant 0 : index
    %c0_22 = arith.constant 0 : index
    %64 = vector.load %arg7[%c0_21, %c0_22] : memref<8x128xf32, #tpu.memory_space<vmem>>, vector<8x128xf32>
    %65 = vector.shape_cast %63 : vector<32x128xf32> to vector<4x8x128xf32>
    %cst_23 = arith.constant dense<0.000000e+00> : vector<8x128xf32>
    %66 = vector.multi_reduction <add>, %65, %cst_23 [0] : vector<4x8x128xf32> to vector<8x128xf32>
    %67 = arith.addf %64, %66 : vector<8x128xf32>
    %c0_24 = arith.constant 0 : index
    %c0_25 = arith.constant 0 : index
    %68 = vector.load %arg7[%c0_24, %c0_25] : memref<8x128xf32, #tpu.memory_space<vmem>>, vector<8x128xf32>
    tpu.vector_store %arg7[%c0_24, %c0_25], %67 {strides = array<i32>} : memref<8x128xf32, #tpu.memory_space<vmem>>, vector<8x128xf32>,
    %c0_i32_26 = arith.constant 0 : i32
    %69 = arith.cmpi eq, %arg1, %c0_i32_26 : i32
    %70 = arith.extui %69 : i1 to i32
    %c0_i32_27 = arith.constant 0 : i32
    %71 = arith.cmpi ne, %70, %c0_i32_27 : i32
    scf.if %71 {
      %c0_28 = arith.constant 0 : index
      %c0_29 = arith.constant 0 : index
      %72 = vector.load %arg7[%c0_28, %c0_29] : memref<8x128xf32, #tpu.memory_space<vmem>>, vector<8x128xf32>
      %73 = vector.shape_cast %72 : vector<8x128xf32> to vector<1x8x128xf32>
      %cst_30 = arith.constant dense<0.000000e+00> : vector<1xf32>
      %74 = vector.multi_reduction <add>, %73, %cst_30 [1, 2] : vector<1x8x128xf32> to vector<1xf32>
      %75 = vector.shape_cast %74 : vector<1xf32> to vector<1x1x1xf32>
      %76 = vector.extract %75[0, 0, 0] : f32 from vector<1x1x1xf32>
      %77 = vector.broadcast %76 : f32 to vector<1x1x1xf32>
      %c0_31 = arith.constant 0 : index
      %c0_32 = arith.constant 0 : index
      %c0_33 = arith.constant 0 : index
      %78 = vector.load %arg6[%c0_31, %c0_32, %c0_33] : memref<1x1x1xf32, #tpu.memory_space<vmem>>, vector<1x1x1xf32>
      tpu.vector_store %arg6[%c0_31, %c0_32, %c0_33], %77 {strides = array<i32>} : memref<1x1x1xf32, #tpu.memory_space<vmem>>, vector<1x1x1xf32>,
    } else {
    }
    return
  }
  func.func @transform_0(%arg0: i32, %arg1: i32) -> (i32, i32) {
    %c0_i32 = arith.constant 0 : i32
    %c0_i32_0 = arith.constant 0 : i32
    %c0_i32_1 = arith.constant 0 : i32
    return %c0_i32, %c0_i32_0 : i32, i32
  }
  func.func @transform_1(%arg0: i32, %arg1: i32) -> (i32, i32) {
    %c0_i32 = arith.constant 0 : i32
    %c0_i32_0 = arith.constant 0 : i32
    %c0_i32_1 = arith.constant 0 : i32
    return %c0_i32, %c0_i32_0 : i32, i32
  }
  func.func @transform_2(%arg0: i32, %arg1: i32) -> (i32, i32) {
    %c1_i32 = arith.constant 1 : i32
    %0 = arith.muli %arg0, %c1_i32 : i32
    %1 = arith.addi %0, %arg1 : i32
    %c0_i32 = arith.constant 0 : i32
    %c0_i32_0 = arith.constant 0 : i32
    return %1, %c0_i32 : i32, i32
  }
  func.func @transform_3(%arg0: i32, %arg1: i32) -> (i32, i32) {
    %c1_i32 = arith.constant 1 : i32
    %0 = arith.muli %arg0, %c1_i32 : i32
    %1 = arith.addi %0, %arg1 : i32
    %c0_i32 = arith.constant 0 : i32
    %c0_i32_0 = arith.constant 0 : i32
    return %1, %c0_i32 : i32, i32
  }
  func.func @transform_4(%arg0: i32, %arg1: i32) -> (i32, i32, i32) {
    %c0_i32 = arith.constant 0 : i32
    %c0_i32_0 = arith.constant 0 : i32
    %c0_i32_1 = arith.constant 0 : i32
    return %arg0, %c0_i32, %c0_i32_0 : i32, i32, i32
  }
}

</mosaic_0001>

<bundles_post_ra>
// kernel: tpu_custom_call.1
= control target key start
LH: loop header
LB: loop body
LE: loop exit
PB: predicated region body
PF: predicated region fallthrough
CT: control target
= control target key end

     0   :  { %9 = vsyncpa [#allocation4], 0  ;;  %s753_s0 = inlined_call_operand.hbm [shape: bf16[128,128], index: 0, kind: input, shape index: {}]   ;;  %s754_s1 = inlined_call_operand.hbm [shape: bf16[16,128], index: 1, kind: input, shape index: {}]   ;;  %s755_s2 = inlined_call_operand.vmem [shape: f32[1,128], index: 2, kind: input, shape index: {}]   ;;  %s756_s3 = inlined_call_operand.vmem [shape: bf16[1,16], index: 3, kind: input, shape index: {}]   ;;  %s757_s4 = inlined_call_operand.hbm [shape: f32[1,1,1], index: 4, kind: output, shape index: {}]  }
   0x1   :  { %10 = vsyncpa [#allocation7], 0 }
   0x2   :  { %11 = vsyncpa [#allocation5], 0  ;;  %s16_s17 = sshll.u32 %s753_s0, 4  ;;  %s642_s18 = smov [#allocation3]   ;;  %s17_s17 = int_to_ptr.hbm [resolvable:$true] %s16_s17 }
   0x3   :  { %s18_s19 = sshll.u32 %s642_s18, 4  ;;  %s29_s22 = sshll.u32 %s754_s1, 4  ;;  %s19_s19 = int_to_ptr.vmem [resolvable:$true] %s18_s19  ;;  %s30_s22 = int_to_ptr.hbm [resolvable:$true] %s29_s22 }
   0x4   :  { %s643_s23 = smov 64   ;;  %s644_s24 = smov 4  }
   0x5   :  { %24 = dma.hbm_to_vmem [thread:$0]  %s17_s17, 1024, %s19_s19, [#allocation4], %s643_s23, %s643_s23, %s644_s24  }
   0x6   :  { %s645_s25 = smov [#allocation6]  }
   0x7   :  { %s31_s26 = sshll.u32 %s645_s25, 4  ;;  %s32_s26 = int_to_ptr.vmem [resolvable:$true] %s31_s26 }
   0x8   :  { %37 = dma.hbm_to_vmem [thread:$0]  %s30_s22, 128, %s32_s26, [#allocation7], %s643_s23, %s643_s23, %s644_s24  }
   0x9   :  { %636 = dma.done.wait [#allocation4], 1024  }
   0xa   :  { %637 = vsyncadd [#allocation4], 4294966272 }
   0xb   :  { %638 = dma.done.wait [#allocation7], 128  }
   0xc   :  { %639 = vsyncadd [#allocation7], 4294967168  ;;  %v104_v0 = vld [vmem:[%s755_s2] sm:$0xff]  ;;  %v529_v2 = vld [vmem:[#allocation3 + $0x30] sm:$0xff]  ;;  %vm361_vm0 = vcmask 130048   ;;  %s468_s13 = sshll.u32 %s757_s4, 4  ;;  %s469_s13 = int_to_ptr.hbm [resolvable:$true] %s468_s13 }
   0xd   :  { %v530_v1 = vld [vmem:[#allocation3 + $0x38] sm:$0xff]  ;;  %108 = vmax.xlane.f32.xlu0 %v104_v0  ;;  %v105_v3 = vld [vmem:[%s755_s2 + $0x8] sm:$0xff]  ;;  %v528_v4 = vld [vmem:[#allocation3 + $0x28] sm:$0xff]  ;;  %vm459_vm5 = vcmask 0  }
   0xe   :  { %237 = vmatpush.bf16.msra.mxu1 %v530_v1  ;;  %206 = vmatpush.bf16.msra.mxu0 %v530_v1  ;;  %v527_v5 = vld [vmem:[#allocation3 + $0x20] sm:$0xff]  ;;  %v526_v6 = vld [vmem:[#allocation3 + $0x18] sm:$0xff]  ;;  %v525_v7 = vld [vmem:[#allocation3 + $0x10] sm:$0xff] }
   0xf   :  { %532 = vmatpush.bf16.msra.mxu3 %v530_v1  ;;  %v524_v8 = vld [vmem:[#allocation3 + $0x8] sm:$0xff]  ;;  %v523_v9 = vld [vmem:[#allocation3] sm:$0xff]  ;;  %v296_v10 = vld [vmem:[%s756_s3] sm:$0x1] }
  0x10   :  { %v297_v11 = vld [vmem:[%s756_s3 + $0x1] sm:$0x1]  ;;  %v298_v12 = vld [vmem:[%s756_s3 + $0x2] sm:$0x1]  ;;  %v299_v13 = vld [vmem:[%s756_s3 + $0x3] sm:$0x1] }
  0x11   :  { %315 = vst [vmem:[#allocation1] ss:$9 sm:$0xff] %v296_v10  ;;  %v300_v14 = vld [vmem:[%s756_s3 + $0x4] sm:$0x1]  ;;  %v531_v15 = vld [vmem:[#allocation6] sm:$0xff]  ;;  %v106_v18 = vld [vmem:[%s755_s2 + $0x10] sm:$0xff] }
  0x12   :  { %238 = vmatpush.bf16.msra.mxu1 %v529_v2  ;;  %207 = vmatpush.bf16.msra.mxu0 %v529_v2  ;;  %318 = vst [vmem:[#allocation1 + $0x1] ss:$9 sm:$0xff] %v297_v11  ;;  %v301_v16 = vld [vmem:[%s756_s3 + $0x5] sm:$0x1]  ;;  %v302_v17 = vld [vmem:[%s756_s3 + $0x6] sm:$0x1] }
  0x13   :  { %533 = vmatpush.bf16.msra.mxu3 %v529_v2  ;;  %321 = vst [vmem:[#allocation1 + $0x2] ss:$9 sm:$0xff] %v298_v12  ;;  %373 = vmatpush.bf16.msra.mxu2 %v531_v15  ;;  %v303_v19 = vld [vmem:[%s756_s3 + $0x7] sm:$0x1]  ;;  %v107_v22 = vld [vmem:[%s755_s2 + $0x18] sm:$0xff] }
  0x14   :  { %324 = vst [vmem:[#allocation1 + $0x3] ss:$9 sm:$0xff] %v299_v13  ;;  %112 = vmax.xlane.f32.xlu1 %v106_v18  ;;  %v304_v46 = vld [vmem:[%s756_s3 + $0x8] sm:$0x1]  ;;  %v305_v47 = vld [vmem:[%s756_s3 + $0x9] sm:$0x1] }
  0x15   :  { %110 = vmax.xlane.f32.xlu0 %v105_v3  ;;  %327 = vst [vmem:[#allocation1 + $0x4] ss:$9 sm:$0xff] %v300_v14  ;;  %v306_v49 = vld [vmem:[%s756_s3 + $0xa] sm:$0x1]  ;;  %v307_v51 = vld [vmem:[%s756_s3 + $0xb] sm:$0x1] }
  0x16   :  { %239 = vmatpush.bf16.msra.mxu1 %v528_v4  ;;  %208 = vmatpush.bf16.msra.mxu0 %v528_v4  ;;  %330 = vst [vmem:[#allocation1 + $0x5] ss:$9 sm:$0xff] %v301_v16  ;;  %v308_v54 = vld [vmem:[%s756_s3 + $0xc] sm:$0x1]  ;;  %v309_v56 = vld [vmem:[%s756_s3 + $0xd] sm:$0x1] }
  0x17   :  { %534 = vmatpush.bf16.msra.mxu3 %v528_v4  ;;  %333 = vst [vmem:[#allocation1 + $0x6] ss:$9 sm:$0xff] %v302_v17  ;;  %v310_v58 = vld [vmem:[%s756_s3 + $0xe] sm:$0x1]  ;;  %v311_v60 = vld [vmem:[%s756_s3 + $0xf] sm:$0x1]  ;;  %v389_v4 = vlaneseq }
  0x18   :  { %336 = vst [vmem:[#allocation1 + $0x7] ss:$9 sm:$0xff] %v303_v19  ;;  %s646_s3 = smov [#allocation8]  }
  0x19   :  { %v390_v15 = vand.u32 127, %v389_v4  ;;  %s466_s10 = sshll.u32 %s646_s3, 4  ;;  %s467_s10 = int_to_ptr.vmem [resolvable:$true] %s466_s10 }
  0x1a   :  { %240 = vmatpush.bf16.msra.mxu1 %v527_v5  ;;  %209 = vmatpush.bf16.msra.mxu0 %v527_v5 }
  0x1b   :  { %535 = vmatpush.bf16.msra.mxu3 %v527_v5 }
  0x1c   :  { %114 = vmax.xlane.f32.xlu1 %v107_v22 }
  0x1e   :  { %241 = vmatpush.bf16.msra.mxu1 %v526_v6  ;;  %210 = vmatpush.bf16.msra.mxu0 %v526_v6 }
  0x1f   :  { %536 = vmatpush.bf16.msra.mxu3 %v526_v6  ;;  %v337_v24 = vld [vmem:[#allocation1] sm:$0xff] }
  0x20   :  { %521 = vmatmul.msk.bf16.vlgmr.msra.gmra.mxu2 %vm361_vm0, %v337_v24  ;;  %339 = vst [vmem:[#allocation1] ss:$9 sm:$0xff] %v304_v46 }
  0x21   :  { %341 = vst [vmem:[#allocation1 + $0x1] ss:$9 sm:$0xff] %v305_v47 }
  0x22   :  { %242 = vmatpush.bf16.msra.mxu1 %v525_v7  ;;  %211 = vmatpush.bf16.msra.mxu0 %v525_v7  ;;  %343 = vst [vmem:[#allocation1 + $0x2] ss:$9 sm:$0xff] %v306_v49 }
  0x23   :  { %537 = vmatpush.bf16.msra.mxu3 %v525_v7  ;;  %345 = vst [vmem:[#allocation1 + $0x3] ss:$9 sm:$0xff] %v307_v51 }
  0x24   :  { %347 = vst [vmem:[#allocation1 + $0x4] ss:$9 sm:$0xff] %v308_v54 }
  0x25   :  { %349 = vst [vmem:[#allocation1 + $0x5] ss:$9 sm:$0xff] %v309_v56 }
  0x26   :  { %243 = vmatpush.bf16.msra.mxu1 %v524_v8  ;;  %212 = vmatpush.bf16.msra.mxu0 %v524_v8  ;;  %351 = vst [vmem:[#allocation1 + $0x6] ss:$9 sm:$0xff] %v310_v58 }
  0x27   :  { %538 = vmatpush.bf16.msra.mxu3 %v524_v8  ;;  %353 = vst [vmem:[#allocation1 + $0x7] ss:$9 sm:$0xff] %v311_v60 }
  0x2a   :  { %244 = vmatpush.bf16.msra.mxu1 %v523_v9  ;;  %213 = vmatpush.bf16.msra.mxu0 %v523_v9 }
  0x2b   :  { %539 = vmatpush.bf16.msra.mxu3 %v523_v9 }
  0x2e   :  { %v354_v13 = vld [vmem:[#allocation1] sm:$0xff] }
  0x30   :  { %522 = vmatmul.msk.bf16.gmra.mxu2 %vm361_vm0, %v354_v13 }
  0x80   :  { %v109_v20 = vpop.xlane.xlu0 %108 }
  0x81   :  { %v711_v21 = vsub.f32 %v104_v0, %v109_v20  ;;  %v406_v20 = vshrl.u32 %v389_v4, 7 }
  0x83   :  { %v120_v23 = vmul.f32 1.442695, %v711_v21  ;;  %vm415_vm2 = vcmp.lt.s32.totalorder %v406_v20, 1 }
  0x85   :  { %552 = vpow2.f32 %v120_v23 }
  0x87   :  { %v113_v40 = vpop.xlane.xlu1 %112 }
  0x88   :  { %v111_v25 = vpop.xlane.xlu0 %110  ;;  %v118_v41 = vsub.f32 %v106_v18, %v113_v40 }
  0x89   :  { %v117_v26 = vsub.f32 %v105_v3, %v111_v25  ;;  %v395_v25 = vand.u32 7, %v390_v15 }
  0x8a   :  { %v124_v43 = vmul.f32 1.442695, %v118_v41 }
  0x8b   :  { %v122_v27 = vmul.f32 1.442695, %v117_v26  ;;  %v718_v28 = vpop.eup %552 }
  0x8c   :  { %v128_v29 = vpack.c.bf16 %v718_v28, %v718_v28 }
  0x8d   :  { %554 = vpow2.f32 %v122_v27 }
  0x8e   :  { %v132_v32 = vunpack.c.l.bf16 %v128_v29  ;;  %v229_v33 = vunpack.c.l.b16 %v128_v29  ;;  %556 = vpow2.f32 %v124_v43 }
  0x8f   :  { %v115_v45 = vpop.xlane.xlu1 %114 }
  0x90   :  { %v136_v37 = vsub.f32 %v718_v28, %v132_v32  ;;  %v119_v48 = vsub.f32 %v107_v22, %v115_v45 }
  0x92   :  { %v126_v53 = vmul.f32 1.442695, %v119_v48 }
  0x93   :  { %v555_v30 = vpop.eup %554 }
  0x94   :  { %v129_v31 = vpack.c.bf16 %v555_v30, %v555_v30  ;;  %v557_v52 = vpop.eup %556  ;;  %558 = vpow2.f32 %v126_v53 }
  0x95   :  { %v130_v59 = vpack.c.bf16 %v557_v52, %v557_v52 }
  0x96   :  { %v230_v34 = vunpack.c.l.b16 %v129_v31  ;;  %v133_v35 = vunpack.c.l.bf16 %v129_v31 }
  0x97   :  { %v134_v62 = vunpack.c.l.bf16 %v130_v59  ;;  %v231_v2 = vunpack.c.l.b16 %v130_v59 }
  0x98   :  { %v233_v36 = vpack.c.b16 %v230_v34, %v229_v33  ;;  %v137_v38 = vsub.f32 %v555_v30, %v133_v35 }
  0x99   :  { %v138_v8 = vsub.f32 %v557_v52, %v134_v62 }
  0x9a   :  { %245 = vmatmul.bf16.vlgmr.msra.gmra.mxu1 %v233_v36  ;;  %v140_v39 = vpack.c.bf16 %v137_v38, %v136_v37  ;;  %v559_v63 = vpop.eup %558 }
  0x9b   :  { %v131_v1 = vpack.c.bf16 %v559_v63, %v559_v63 }
  0x9c   :  { %214 = vmatmul.bf16.vlgmr.msra.gmra.mxu0 %v140_v39 }
  0x9d   :  { %v135_v7 = vunpack.c.l.bf16 %v131_v1  ;;  %v232_v9 = vunpack.c.l.b16 %v131_v1 }
  0x9f   :  { %v139_v11 = vsub.f32 %v559_v63, %v135_v7  ;;  %v234_v12 = vpack.c.b16 %v232_v9, %v231_v2 }
  0xa1   :  { %v141_v18 = vpack.c.bf16 %v139_v11, %v138_v8 }
  0xa3   :  { %v375_v42 = vpop.f32.mrf.mxu2  ;;  %219 = vmatmul.bf16.vlgmr.msra.gmra.mxu3 %v141_v18 }
  0xa4   :  { %v541_v3 = vceil.f32 %v375_v42  ;;  %v542_v6 = vfloor.f32 %v375_v42  ;;  %vm540_vm1 = vcmp.lt.s32.totalorder %v375_v42, 0 }
  0xa6   :  { %v543_v17 = vsel %vm540_vm1, %v541_v3, %v542_v6 }
  0xa7   :  { %v544_v24 = vcvt.f32.s32 %v543_v17 }
  0xa9   :  { %vm419_vm3 = vcmp.eq.s32.totalorder %v395_v25, %v544_v24 }
  0xaa   :  { %250 = vmatmul.bf16.gmra.mxu1 %v234_v12  ;;  %vm423_vm4 = vmand %vm415_vm2, %vm419_vm3 }
  0xab   :  { %v377_v44 = vpop.f32.mrf.mxu2 }
  0xb3   :  { %v380_v36 = vpop.f32.mrf.mxu2 }
  0xbb   :  { %v382_v42 = vpop.f32.mrf.mxu2 }
 0x117   :  { %v246_v50 = vpop.f32.mrf.mxu1 }
 0x119   :  { %v215_v55 = vpop.f32.mrf.mxu0 }
 0x11a   :  { %v247_v57 = vadd.f32 %v246_v50, %v215_v55 }
 0x11c   :  { %560 = vrcp.f32 %v247_v57 }
 0x11d   :  { %562 = vlog2.f32 %v247_v57 }
 0x11f   :  { %v248_v61 = vpop.f32.mrf.mxu1 }
 0x121   :  { %v217_v0 = vpop.f32.mrf.mxu0 }
 0x122   :  { %v561_v5 = vpop.eup %560 }
 0x123   :  { %v272_v10 = vmul.f32 %v561_v5, %v247_v57  ;;  %v563_v16 = vpop.eup %562 }
 0x124   :  { %v257_v22 = vmul.f32 0.6931472, %v563_v16 }
 0x125   :  { %v276_v14 = vsub.f32 2.0, %v272_v10 }
 0x126   :  { %v264_v27 = vsub.f32 %v711_v21, %v257_v22  ;;  %v220_v38 = vpop.f32.mrf.mxu3 }
 0x127   :  { %v280_v19 = vmul.f32 %v561_v5, %v276_v14  ;;  %v251_v33 = vpop.f32.mrf.mxu1 }
 0x129   :  { %v284_v23 = vmul.f32 %v718_v28, %v280_v19 }
 0x12b   :  { %v288_v26 = vsub.f32 1.0, %v284_v23 }
 0x12d   :  { %v292_v29 = vmul.f32 %v288_v26, %v288_v26 }
 0x12e   :  { %v222_v43 = vpop.f32.mrf.mxu3 }
 0x12f   :  { %v427_v30 = vmul.f32 %v292_v29, %v264_v27  ;;  %v253_v28 = vpop.f32.mrf.mxu1 }
 0x131   :  { %v431_v31 = vsub.f32 0.0, %v427_v30 }
 0x133   :  { %v435_v32 = vsel %vm423_vm4, %v431_v31, 0.0 }
 0x134   :  { %449 = vadd.xlane.f32.xlu2 %v435_v32 }
 0x1a7   :  { %v450_v34 = vpop.xlane.xlu2 %449 }
 0x1a8   :  { %v451_v35 = vrot.slane %v450_v34, 4 }
 0x1aa   :  { %v452_v37 = vadd.f32 %v451_v35, %v450_v34 }
 0x1ac   :  { %v453_v39 = vrot.slane %v452_v37, 2 }
 0x1ae   :  { %v454_v40 = vadd.f32 %v453_v39, %v452_v37 }
 0x1b0   :  { %v455_v41 = vrot.slane %v454_v40, 1 }
 0x1b2   :  { %v456_v21 = vadd.f32 %v455_v41, %v454_v40 }
 0x1b4   :  { %545 = vpush %v456_v21 }
 0x1e5   :  { %s546_s14 = spop %545 }
 0x1e6   :  { %v458_v44 = vstv %s546_s14 }
 0x1e7   :  { %460 = vst.msk [vmem:[#allocation8] sm:$0x1] %vm459_vm5, %v458_v44 }
 0x1e8   :  { %471 = dma.vmem_to_hbm [thread:$0]  %s467_s10, 16, %s469_s13, [#allocation5]  }
 0x1e9   :  { %640 = dma.done.wait [#allocation5], 16  }
 0x1ea   :  { %641 = vsyncadd [#allocation5], 4294967280 }
 0x1eb   :  { %476 = vsyncpa [#allocation4], 1 }
 0x1ec   :  { %477 = vsyncpa [#allocation7], 1 }
 0x1ed   :  { %478 = vsyncpa [#allocation5], 1 }

</bundles_post_ra>
